<compile_context>
chip_gen: v7x
topology: tpu7x:2x2x1
jax: 0.10.0
libtpu: 0.0.40
codegen_flags: <defaults>
</compile_context>

<pallas_src>
import jax
import jax.numpy as jnp
import numpy as np
from jax.experimental import pallas as pl
from jax.experimental.pallas import tpu as pltpu

LANE = 128
SUBLANE = 8


def _round_up(x, m):
    return ((x + m - 1) // m) * m


def _cdiv(a, b):
    return (a + b - 1) // b


def _vmem_capacity_bytes():
    try:
        info = pltpu.get_tpu_info()
        cap = getattr(info, "vmem_capacity_bytes", None)
        if cap:
            return int(cap)
    except Exception:
        pass
    return 64 * 1024 * 1024  # conservative (v7x-sized) default


def _actor_kernel(ma_ref, x_ref,
                  w1_ref, b1_ref, w2_ref, b2_ref,
                  w3_ref, b3_ref, w4_ref, b4_ref,
                  out_ref):
    # One batch tile per grid step.  Weights/biases are VMEM-resident bf16;
    # all MXU accumulation is f32.  x arrives already cast to bf16.
    x = x_ref[...]

    h = jnp.dot(x, w1_ref[...], preferred_element_type=jnp.float32) + b1_ref[...]
    h = jnp.maximum(h, 0.0).astype(jnp.bfloat16)                     # relu

    h = jnp.dot(h, w2_ref[...], preferred_element_type=jnp.float32) + b2_ref[...]
    h = jnp.maximum(h, 0.0).astype(jnp.bfloat16)                     # relu

    h = jnp.dot(h, w3_ref[...], preferred_element_type=jnp.float32) + b3_ref[...]
    h = jnp.maximum(h, 0.0).astype(jnp.bfloat16)                     # relu

    a = jnp.dot(h, w4_ref[...], preferred_element_type=jnp.float32) + b4_ref[...]
    act = jnp.tanh(a) * ma_ref[0, 0]
    # Store only the real action columns: the lane padding of the last layer
    # never reaches HBM, so no second slice pass is needed in the wrapper.
    out_ref[...] = act[:, : out_ref.shape[-1]].astype(out_ref.dtype)


def actor_forward(state, params, max_action, *, tm=None):
    """state: (B, state_dim) float. params: dict of (in,out) weights, (1,out) biases."""
    state = jnp.asarray(state)
    B, state_dim = state.shape
    action_dim = params["w4"].shape[1]

    bp = _round_up(B, SUBLANE)

    # --- generation-aware tile / VMEM-limit selection ------------------------
    vmem_cap = _vmem_capacity_bytes()
    if vmem_cap >= 128 * 1024 * 1024:        # v5e / v6e class
        tm_cap, vmem_limit = 8192, 96 * 1024 * 1024
    else:                                    # v7x class (64 MiB physical VMEM)
        tm_cap, vmem_limit = 4096, 48 * 1024 * 1024
    vmem_limit = min(vmem_limit, max(vmem_cap - 8 * 1024 * 1024, 16 * 1024 * 1024))

    if tm is None:
        num_tiles = _cdiv(bp, tm_cap)
        if bp >= 2048:
            # Enough rows to be worth splitting; keep an even tile count so the
            # two v7x TensorCores both get work (harmless on 1-core chips).
            num_tiles = max(num_tiles, 2)
            num_tiles += num_tiles % 2
        tm = _cdiv(bp, num_tiles)
    tm = max(SUBLANE, _round_up(min(tm, bp), SUBLANE))
    grid = _cdiv(bp, tm)                      # last tile may be partial (masked)

    # --- parameter packing (bf16 weights, lane-padded minor dims) ------------
    h3p = _round_up(params["w3"].shape[1], LANE)     # 64  -> 128
    ap = _round_up(action_dim, LANE)                 # act -> 128 (in-kernel only)

    def pad2(a, rows, cols):
        return jnp.pad(a, ((0, rows - a.shape[0]), (0, cols - a.shape[1])))

    w1 = params["w1"].astype(jnp.bfloat16)
    w2 = params["w2"].astype(jnp.bfloat16)
    w3 = pad2(params["w3"], params["w3"].shape[0], h3p).astype(jnp.bfloat16)
    w4 = pad2(params["w4"], h3p, ap).astype(jnp.bfloat16)
    b1 = params["b1"].astype(jnp.float32)
    b2 = params["b2"].astype(jnp.float32)
    b3 = pad2(params["b3"].astype(jnp.float32), 1, h3p)
    b4 = pad2(params["b4"].astype(jnp.float32), 1, ap)

    # bf16 input: halves the state HBM->VMEM DMA bytes.  Do NOT pad state_dim
    # to 128 -- that would 8x the input DMA for no MXU benefit.
    x = jnp.pad(state.astype(jnp.bfloat16), ((0, bp - B), (0, 0)))
    ma = jnp.full((1, 1), max_action, dtype=jnp.float32)

    weight_args = (w1, b1, w2, b2, w3, b3, w4, b4)

    flops = 2 * bp * sum(int(w.shape[0]) * int(w.shape[1]) for w in (w1, w2, w3, w4))
    bytes_accessed = (
        int(x.size) * 2 + bp * action_dim * 4
        + sum(int(np.prod(a.shape)) * a.dtype.itemsize for a in weight_args))
    cost = pl.CostEstimate(flops=int(flops), transcendentals=int(bp * ap),
                           bytes_accessed=int(bytes_accessed))

    def build(single_buffer_weights):
        def resident(a):
            # Full-array block with a constant index_map -> stays in VMEM
            # across the whole batch grid (no per-step re-fetch).  Single
            # buffered when supported: nothing is ever re-fetched, so the
            # second pipeline buffer is pure waste (~140 KiB).
            kw = {"pipeline_mode": pl.Buffered(1)} if single_buffer_weights else {}
            return pl.BlockSpec(a.shape, lambda i: (0, 0), **kw)

        return pl.pallas_call(
            _actor_kernel,
            out_shape=jax.ShapeDtypeStruct((bp, action_dim), jnp.float32),
            grid=(grid,),
            in_specs=[pl.BlockSpec(memory_space=pltpu.MemorySpace.SMEM),   # max_action
                      pl.BlockSpec((tm, state_dim), lambda i: (i, 0))]     # state tile
                     + [resident(a) for a in weight_args],
            out_specs=pl.BlockSpec((tm, action_dim), lambda i: (i, 0)),
            compiler_params=pltpu.CompilerParams(
                dimension_semantics=("parallel",),
                vmem_limit_bytes=int(vmem_limit)),
            cost_estimate=cost,
        )

    args = (ma, x) + weight_args
    try:
        out = build(True)(*args)
    except Exception:
        # Fallback if this runtime rejects pl.Buffered(1): default
        # (double-buffered) resident specs -- identical results.
        out = build(False)(*args)

    # Only the (at most 7-row) batch padding needs dropping; the action-dim
    # padding never left the kernel.
    return out if bp == B else out[:B]


def init_actor_params(key, state_dim, action_dim):
    """Deterministic init mirroring the PyTorch module's __init__.

    PyTorch nn.Linear weight shape is (out, in); normalize_weight uses
    v = 1/sqrt(size[0]) = 1/sqrt(out_features).  Weights are stored (in, out)
    for the kernel with the same ranges.  Biases use PyTorch's default Linear
    init range 1/sqrt(in_features).
    """
    EPS = 0.003
    dims = [(state_dim, 256), (256, 128), (128, 64), (64, action_dim)]
    params = {}
    keys = jax.random.split(key, 8)
    for i, (fan_in, fan_out) in enumerate(dims):
        if i < 3:
            wv = 1.0 / np.sqrt(fan_out)   # normalize_weight: 1/sqrt(out_features)
        else:
            wv = EPS                      # fc4: uniform(-EPS, EPS)
        bv = 1.0 / np.sqrt(fan_in)        # default PyTorch bias init
        w = jax.random.uniform(keys[2 * i], (fan_in, fan_out),
                               minval=-wv, maxval=wv, dtype=jnp.float32)
        b = jax.random.uniform(keys[2 * i + 1], (1, fan_out),
                               minval=-bv, maxval=bv, dtype=jnp.float32)
        params[f"w{i + 1}"] = w
        params[f"b{i + 1}"] = b
    return params


if __name__ == "__main__":
    key = jax.random.PRNGKey(0)
    k_param, k_s1, k_s2 = jax.random.split(key, 3)

    state_dim, action_dim, max_action = 16, 4, 2.0
    params = init_actor_params(k_param, state_dim, action_dim)

    # Pure-JAX reference with identical numerics (bf16 weights/activations,
    # f32 accumulation), outside Pallas.
    # TODO(synk): bf16 weights intentionally diverge ~1e-2 from the pure-f32
    # PyTorch Actor; keep f32 weights if exact parity is required.
    def ref(x):
        def dense(h, w, b):
            return jnp.dot(h.astype(jnp.bfloat16), w.astype(jnp.bfloat16),
                           preferred_element_type=jnp.float32) + b
        h = jnp.maximum(dense(x, params["w1"], params["b1"]), 0.0)
        h = jnp.maximum(dense(h, params["w2"], params["b2"]), 0.0)
        h = jnp.maximum(dense(h, params["w3"], params["b3"]), 0.0)
        return jnp.tanh(dense(h, params["w4"], params["b4"])) * max_action

    # Small (inference-style) batch.
    s_small = jax.random.normal(k_s1, (2, state_dim), dtype=jnp.float32)
    a_small = jax.block_until_ready(actor_forward(s_small, params, max_action))
    assert a_small.shape == (2, action_dim)
    np.testing.assert_allclose(np.asarray(a_small), np.asarray(ref(s_small)),
                               rtol=1e-4, atol=1e-4)

    # Larger (training-style) batch: exercises the multi-tile grid, the even
    # tile split for the v7x cores, and the masked partial last tile.
    s_big = jax.random.normal(k_s2, (2050, state_dim), dtype=jnp.float32)
    a_big = jax.block_until_ready(actor_forward(s_big, params, max_action))
    assert a_big.shape == (2050, action_dim)
    np.testing.assert_allclose(np.asarray(a_big), np.asarray(ref(s_big)),
                               rtol=1e-4, atol=1e-4)

    print("KERNEL_OK")
</pallas_src>

<mosaic_0001>
module attributes {stable_mosaic.version = 11 : i64} {
  func.func @_actor_kernel(%arg0: i32, %arg1: memref<1x1xf32, #tpu.memory_space<smem>>, %arg2: memref<8x16xbf16, #tpu.memory_space<vmem>>, %arg3: memref<16x256xbf16, #tpu.memory_space<vmem>>, %arg4: memref<1x256xf32, #tpu.memory_space<vmem>>, %arg5: memref<256x128xbf16, #tpu.memory_space<vmem>>, %arg6: memref<1x128xf32, #tpu.memory_space<vmem>>, %arg7: memref<128x128xbf16, #tpu.memory_space<vmem>>, %arg8: memref<1x128xf32, #tpu.memory_space<vmem>>, %arg9: memref<128x128xbf16, #tpu.memory_space<vmem>>, %arg10: memref<1x128xf32, #tpu.memory_space<vmem>>, %arg11: memref<8x4xf32, #tpu.memory_space<vmem>>) attributes {dimension_semantics = [#tpu.dimension_semantics<parallel>], iteration_bounds = array<i64: 1>, scalar_prefetch = 0 : i64, scratch_operands = 0 : i64, tpu.core_type = #tpu.core_type<tc>, window_params = [{transform_indices = @transform_0, window_bounds = array<i64: 1, 1>}, {transform_indices = @transform_1, window_bounds = array<i64: 8, 16>}, {pipeline_mode = #tpu.pipeline_mode<synchronous>, transform_indices = @transform_2, window_bounds = array<i64: 16, 256>}, {pipeline_mode = #tpu.pipeline_mode<synchronous>, transform_indices = @transform_3, window_bounds = array<i64: 1, 256>}, {pipeline_mode = #tpu.pipeline_mode<synchronous>, transform_indices = @transform_4, window_bounds = array<i64: 256, 128>}, {pipeline_mode = #tpu.pipeline_mode<synchronous>, transform_indices = @transform_5, window_bounds = array<i64: 1, 128>}, {pipeline_mode = #tpu.pipeline_mode<synchronous>, transform_indices = @transform_6, window_bounds = array<i64: 128, 128>}, {pipeline_mode = #tpu.pipeline_mode<synchronous>, transform_indices = @transform_7, window_bounds = array<i64: 1, 128>}, {pipeline_mode = #tpu.pipeline_mode<synchronous>, transform_indices = @transform_8, window_bounds = array<i64: 128, 128>}, {pipeline_mode = #tpu.pipeline_mode<synchronous>, transform_indices = @transform_9, window_bounds = array<i64: 1, 128>}, {transform_indices = @transform_10, window_bounds = array<i64: 8, 4>}]} {
    %c0 = arith.constant 0 : index
    %c0_0 = arith.constant 0 : index
    %0 = vector.load %arg2[%c0, %c0_0] : memref<8x16xbf16, #tpu.memory_space<vmem>>, vector<8x16xbf16>
    %c0_1 = arith.constant 0 : index
    %c0_2 = arith.constant 0 : index
    %1 = vector.load %arg3[%c0_1, %c0_2] : memref<16x256xbf16, #tpu.memory_space<vmem>>, vector<16x256xbf16>
    %cst = arith.constant dense<0.000000e+00> : vector<8x256xf32>
    %2 = tpu.matmul %0, %1, %cst {dimension_numbers = #tpu.dot_dimension_numbers<[1], [0], [0], [1], [0, 0, 1, 1], [], []>} : vector<8x16xbf16>, vector<16x256xbf16>, vector<8x256xf32> -> vector<8x256xf32>
    %c0_3 = arith.constant 0 : index
    %c0_4 = arith.constant 0 : index
    %3 = vector.load %arg4[%c0_3, %c0_4] : memref<1x256xf32, #tpu.memory_space<vmem>>, vector<1x256xf32>
    %4 = vector.broadcast %3 : vector<1x256xf32> to vector<8x256xf32>
    %5 = arith.addf %2, %4 : vector<8x256xf32>
    %cst_5 = arith.constant 0.000000e+00 : f32
    %6 = vector.broadcast %cst_5 : f32 to vector<8x256xf32>
    %7 = arith.maximumf %5, %6 : vector<8x256xf32>
    %8 = arith.truncf %7 : vector<8x256xf32> to vector<8x256xbf16>
    %c0_6 = arith.constant 0 : index
    %c0_7 = arith.constant 0 : index
    %9 = vector.load %arg5[%c0_6, %c0_7] : memref<256x128xbf16, #tpu.memory_space<vmem>>, vector<256x128xbf16>
    %cst_8 = arith.constant dense<0.000000e+00> : vector<8x128xf32>
    %10 = tpu.matmul %8, %9, %cst_8 {dimension_numbers = #tpu.dot_dimension_numbers<[1], [0], [0], [1], [0, 0, 1, 1], [], []>} : vector<8x256xbf16>, vector<256x128xbf16>, vector<8x128xf32> -> vector<8x128xf32>
    %c0_9 = arith.constant 0 : index
    %c0_10 = arith.constant 0 : index
    %11 = vector.load %arg6[%c0_9, %c0_10] : memref<1x128xf32, #tpu.memory_space<vmem>>, vector<1x128xf32>
    %12 = vector.broadcast %11 : vector<1x128xf32> to vector<8x128xf32>
    %13 = arith.addf %10, %12 : vector<8x128xf32>
    %cst_11 = arith.constant 0.000000e+00 : f32
    %14 = vector.broadcast %cst_11 : f32 to vector<8x128xf32>
    %15 = arith.maximumf %13, %14 : vector<8x128xf32>
    %16 = arith.truncf %15 : vector<8x128xf32> to vector<8x128xbf16>
    %c0_12 = arith.constant 0 : index
    %c0_13 = arith.constant 0 : index
    %17 = vector.load %arg7[%c0_12, %c0_13] : memref<128x128xbf16, #tpu.memory_space<vmem>>, vector<128x128xbf16>
    %cst_14 = arith.constant dense<0.000000e+00> : vector<8x128xf32>
    %18 = tpu.matmul %16, %17, %cst_14 {dimension_numbers = #tpu.dot_dimension_numbers<[1], [0], [0], [1], [0, 0, 1, 1], [], []>} : vector<8x128xbf16>, vector<128x128xbf16>, vector<8x128xf32> -> vector<8x128xf32>
    %c0_15 = arith.constant 0 : index
    %c0_16 = arith.constant 0 : index
    %19 = vector.load %arg8[%c0_15, %c0_16] : memref<1x128xf32, #tpu.memory_space<vmem>>, vector<1x128xf32>
    %20 = vector.broadcast %19 : vector<1x128xf32> to vector<8x128xf32>
    %21 = arith.addf %18, %20 : vector<8x128xf32>
    %cst_17 = arith.constant 0.000000e+00 : f32
    %22 = vector.broadcast %cst_17 : f32 to vector<8x128xf32>
    %23 = arith.maximumf %21, %22 : vector<8x128xf32>
    %24 = arith.truncf %23 : vector<8x128xf32> to vector<8x128xbf16>
    %c0_18 = arith.constant 0 : index
    %c0_19 = arith.constant 0 : index
    %25 = vector.load %arg9[%c0_18, %c0_19] : memref<128x128xbf16, #tpu.memory_space<vmem>>, vector<128x128xbf16>
    %cst_20 = arith.constant dense<0.000000e+00> : vector<8x128xf32>
    %26 = tpu.matmul %24, %25, %cst_20 {dimension_numbers = #tpu.dot_dimension_numbers<[1], [0], [0], [1], [0, 0, 1, 1], [], []>} : vector<8x128xbf16>, vector<128x128xbf16>, vector<8x128xf32> -> vector<8x128xf32>
    %c0_21 = arith.constant 0 : index
    %c0_22 = arith.constant 0 : index
    %27 = vector.load %arg10[%c0_21, %c0_22] : memref<1x128xf32, #tpu.memory_space<vmem>>, vector<1x128xf32>
    %28 = vector.broadcast %27 : vector<1x128xf32> to vector<8x128xf32>
    %29 = arith.addf %26, %28 : vector<8x128xf32>
    %30 = math.tanh %29 : vector<8x128xf32>
    %c0_23 = arith.constant 0 : index
    %c0_24 = arith.constant 0 : index
    %31 = memref.load %arg1[%c0_23, %c0_24] : memref<1x1xf32, #tpu.memory_space<smem>>
    %32 = vector.broadcast %31 : f32 to vector<8x128xf32>
    %33 = arith.mulf %30, %32 : vector<8x128xf32>
    %34 = vector.extract_strided_slice %33 {offsets = [0, 0], sizes = [8, 4], strides = [1, 1]} : vector<8x128xf32> to vector<8x4xf32>
    %c0_25 = arith.constant 0 : index
    %c0_26 = arith.constant 0 : index
    %35 = vector.load %arg11[%c0_25, %c0_26] : memref<8x4xf32, #tpu.memory_space<vmem>>, vector<8x4xf32>
    tpu.vector_store %arg11[%c0_25, %c0_26], %34 {strides = array<i32>} : memref<8x4xf32, #tpu.memory_space<vmem>>, vector<8x4xf32>,
    return
  }
  func.func @transform_0(%arg0: i32) -> (i32, i32) {
    %c0_i32 = arith.constant 0 : i32
    %c0_i32_0 = arith.constant 0 : i32
    %c0_i32_1 = arith.constant 0 : i32
    return %c0_i32, %c0_i32_0 : i32, i32
  }
  func.func @transform_1(%arg0: i32) -> (i32, i32) {
    %c0_i32 = arith.constant 0 : i32
    %c0_i32_0 = arith.constant 0 : i32
    return %arg0, %c0_i32 : i32, i32
  }
  func.func @transform_2(%arg0: i32) -> (i32, i32) {
    %c0_i32 = arith.constant 0 : i32
    %c0_i32_0 = arith.constant 0 : i32
    %c0_i32_1 = arith.constant 0 : i32
    return %c0_i32, %c0_i32_0 : i32, i32
  }
  func.func @transform_3(%arg0: i32) -> (i32, i32) {
    %c0_i32 = arith.constant 0 : i32
    %c0_i32_0 = arith.constant 0 : i32
    %c0_i32_1 = arith.constant 0 : i32
    return %c0_i32, %c0_i32_0 : i32, i32
  }
  func.func @transform_4(%arg0: i32) -> (i32, i32) {
    %c0_i32 = arith.constant 0 : i32
    %c0_i32_0 = arith.constant 0 : i32
    %c0_i32_1 = arith.constant 0 : i32
    return %c0_i32, %c0_i32_0 : i32, i32
  }
  func.func @transform_5(%arg0: i32) -> (i32, i32) {
    %c0_i32 = arith.constant 0 : i32
    %c0_i32_0 = arith.constant 0 : i32
    %c0_i32_1 = arith.constant 0 : i32
    return %c0_i32, %c0_i32_0 : i32, i32
  }
  func.func @transform_6(%arg0: i32) -> (i32, i32) {
    %c0_i32 = arith.constant 0 : i32
    %c0_i32_0 = arith.constant 0 : i32
    %c0_i32_1 = arith.constant 0 : i32
    return %c0_i32, %c0_i32_0 : i32, i32
  }
  func.func @transform_7(%arg0: i32) -> (i32, i32) {
    %c0_i32 = arith.constant 0 : i32
    %c0_i32_0 = arith.constant 0 : i32
    %c0_i32_1 = arith.constant 0 : i32
    return %c0_i32, %c0_i32_0 : i32, i32
  }
  func.func @transform_8(%arg0: i32) -> (i32, i32) {
    %c0_i32 = arith.constant 0 : i32
    %c0_i32_0 = arith.constant 0 : i32
    %c0_i32_1 = arith.constant 0 : i32
    return %c0_i32, %c0_i32_0 : i32, i32
  }
  func.func @transform_9(%arg0: i32) -> (i32, i32) {
    %c0_i32 = arith.constant 0 : i32
    %c0_i32_0 = arith.constant 0 : i32
    %c0_i32_1 = arith.constant 0 : i32
    return %c0_i32, %c0_i32_0 : i32, i32
  }
  func.func @transform_10(%arg0: i32) -> (i32, i32) {
    %c0_i32 = arith.constant 0 : i32
    %c0_i32_0 = arith.constant 0 : i32
    return %arg0, %c0_i32 : i32, i32
  }
}

module attributes {stable_mosaic.version = 11 : i64} {
  func.func @_actor_kernel(%arg0: i32, %arg1: memref<1x1xf32, #tpu.memory_space<smem>>, %arg2: memref<8x16xbf16, #tpu.memory_space<vmem>>, %arg3: memref<16x256xbf16, #tpu.memory_space<vmem>>, %arg4: memref<1x256xf32, #tpu.memory_space<vmem>>, %arg5: memref<256x128xbf16, #tpu.memory_space<vmem>>, %arg6: memref<1x128xf32, #tpu.memory_space<vmem>>, %arg7: memref<128x128xbf16, #tpu.memory_space<vmem>>, %arg8: memref<1x128xf32, #tpu.memory_space<vmem>>, %arg9: memref<128x128xbf16, #tpu.memory_space<vmem>>, %arg10: memref<1x128xf32, #tpu.memory_space<vmem>>, %arg11: memref<8x4xf32, #tpu.memory_space<vmem>>) attributes {dimension_semantics = [#tpu.dimension_semantics<parallel>], iteration_bounds = array<i64: 1>, scalar_prefetch = 0 : i64, scratch_operands = 0 : i64, tpu.core_type = #tpu.core_type<tc>, window_params = [{transform_indices = @transform_0, window_bounds = array<i64: 1, 1>}, {transform_indices = @transform_1, window_bounds = array<i64: 8, 16>}, {pipeline_mode = #tpu.pipeline_mode<synchronous>, transform_indices = @transform_2, window_bounds = array<i64: 16, 256>}, {pipeline_mode = #tpu.pipeline_mode<synchronous>, transform_indices = @transform_3, window_bounds = array<i64: 1, 256>}, {pipeline_mode = #tpu.pipeline_mode<synchronous>, transform_indices = @transform_4, window_bounds = array<i64: 256, 128>}, {pipeline_mode = #tpu.pipeline_mode<synchronous>, transform_indices = @transform_5, window_bounds = array<i64: 1, 128>}, {pipeline_mode = #tpu.pipeline_mode<synchronous>, transform_indices = @transform_6, window_bounds = array<i64: 128, 128>}, {pipeline_mode = #tpu.pipeline_mode<synchronous>, transform_indices = @transform_7, window_bounds = array<i64: 1, 128>}, {pipeline_mode = #tpu.pipeline_mode<synchronous>, transform_indices = @transform_8, window_bounds = array<i64: 128, 128>}, {pipeline_mode = #tpu.pipeline_mode<synchronous>, transform_indices = @transform_9, window_bounds = array<i64: 1, 128>}, {transform_indices = @transform_10, window_bounds = array<i64: 8, 4>}]} {
    %c0 = arith.constant 0 : index
    %c0_0 = arith.constant 0 : index
    %0 = vector.load %arg2[%c0, %c0_0] : memref<8x16xbf16, #tpu.memory_space<vmem>>, vector<8x16xbf16>
    %c0_1 = arith.constant 0 : index
    %c0_2 = arith.constant 0 : index
    %1 = vector.load %arg3[%c0_1, %c0_2] : memref<16x256xbf16, #tpu.memory_space<vmem>>, vector<16x256xbf16>
    %cst = arith.constant dense<0.000000e+00> : vector<8x256xf32>
    %2 = tpu.matmul %0, %1, %cst {dimension_numbers = #tpu.dot_dimension_numbers<[1], [0], [0], [1], [0, 0, 1, 1], [], []>} : vector<8x16xbf16>, vector<16x256xbf16>, vector<8x256xf32> -> vector<8x256xf32>
    %c0_3 = arith.constant 0 : index
    %c0_4 = arith.constant 0 : index
    %3 = vector.load %arg4[%c0_3, %c0_4] : memref<1x256xf32, #tpu.memory_space<vmem>>, vector<1x256xf32>
    %4 = vector.broadcast %3 : vector<1x256xf32> to vector<8x256xf32>
    %5 = arith.addf %2, %4 : vector<8x256xf32>
    %cst_5 = arith.constant 0.000000e+00 : f32
    %6 = vector.broadcast %cst_5 : f32 to vector<8x256xf32>
    %7 = arith.maximumf %5, %6 : vector<8x256xf32>
    %8 = arith.truncf %7 : vector<8x256xf32> to vector<8x256xbf16>
    %c0_6 = arith.constant 0 : index
    %c0_7 = arith.constant 0 : index
    %9 = vector.load %arg5[%c0_6, %c0_7] : memref<256x128xbf16, #tpu.memory_space<vmem>>, vector<256x128xbf16>
    %cst_8 = arith.constant dense<0.000000e+00> : vector<8x128xf32>
    %10 = tpu.matmul %8, %9, %cst_8 {dimension_numbers = #tpu.dot_dimension_numbers<[1], [0], [0], [1], [0, 0, 1, 1], [], []>} : vector<8x256xbf16>, vector<256x128xbf16>, vector<8x128xf32> -> vector<8x128xf32>
    %c0_9 = arith.constant 0 : index
    %c0_10 = arith.constant 0 : index
    %11 = vector.load %arg6[%c0_9, %c0_10] : memref<1x128xf32, #tpu.memory_space<vmem>>, vector<1x128xf32>
    %12 = vector.broadcast %11 : vector<1x128xf32> to vector<8x128xf32>
    %13 = arith.addf %10, %12 : vector<8x128xf32>
    %cst_11 = arith.constant 0.000000e+00 : f32
    %14 = vector.broadcast %cst_11 : f32 to vector<8x128xf32>
    %15 = arith.maximumf %13, %14 : vector<8x128xf32>
    %16 = arith.truncf %15 : vector<8x128xf32> to vector<8x128xbf16>
    %c0_12 = arith.constant 0 : index
    %c0_13 = arith.constant 0 : index
    %17 = vector.load %arg7[%c0_12, %c0_13] : memref<128x128xbf16, #tpu.memory_space<vmem>>, vector<128x128xbf16>
    %cst_14 = arith.constant dense<0.000000e+00> : vector<8x128xf32>
    %18 = tpu.matmul %16, %17, %cst_14 {dimension_numbers = #tpu.dot_dimension_numbers<[1], [0], [0], [1], [0, 0, 1, 1], [], []>} : vector<8x128xbf16>, vector<128x128xbf16>, vector<8x128xf32> -> vector<8x128xf32>
    %c0_15 = arith.constant 0 : index
    %c0_16 = arith.constant 0 : index
    %19 = vector.load %arg8[%c0_15, %c0_16] : memref<1x128xf32, #tpu.memory_space<vmem>>, vector<1x128xf32>
    %20 = vector.broadcast %19 : vector<1x128xf32> to vector<8x128xf32>
    %21 = arith.addf %18, %20 : vector<8x128xf32>
    %cst_17 = arith.constant 0.000000e+00 : f32
    %22 = vector.broadcast %cst_17 : f32 to vector<8x128xf32>
    %23 = arith.maximumf %21, %22 : vector<8x128xf32>
    %24 = arith.truncf %23 : vector<8x128xf32> to vector<8x128xbf16>
    %c0_18 = arith.constant 0 : index
    %c0_19 = arith.constant 0 : index
    %25 = vector.load %arg9[%c0_18, %c0_19] : memref<128x128xbf16, #tpu.memory_space<vmem>>, vector<128x128xbf16>
    %cst_20 = arith.constant dense<0.000000e+00> : vector<8x128xf32>
    %26 = tpu.matmul %24, %25, %cst_20 {dimension_numbers = #tpu.dot_dimension_numbers<[1], [0], [0], [1], [0, 0, 1, 1], [], []>} : vector<8x128xbf16>, vector<128x128xbf16>, vector<8x128xf32> -> vector<8x128xf32>
    %c0_21 = arith.constant 0 : index
    %c0_22 = arith.constant 0 : index
    %27 = vector.load %arg10[%c0_21, %c0_22] : memref<1x128xf32, #tpu.memory_space<vmem>>, vector<1x128xf32>
    %28 = vector.broadcast %27 : vector<1x128xf32> to vector<8x128xf32>
    %29 = arith.addf %26, %28 : vector<8x128xf32>
    %30 = math.tanh %29 : vector<8x128xf32>
    %c0_23 = arith.constant 0 : index
    %c0_24 = arith.constant 0 : index
    %31 = memref.load %arg1[%c0_23, %c0_24] : memref<1x1xf32, #tpu.memory_space<smem>>
    %32 = vector.broadcast %31 : f32 to vector<8x128xf32>
    %33 = arith.mulf %30, %32 : vector<8x128xf32>
    %34 = vector.extract_strided_slice %33 {offsets = [0, 0], sizes = [8, 4], strides = [1, 1]} : vector<8x128xf32> to vector<8x4xf32>
    %c0_25 = arith.constant 0 : index
    %c0_26 = arith.constant 0 : index
    %35 = vector.load %arg11[%c0_25, %c0_26] : memref<8x4xf32, #tpu.memory_space<vmem>>, vector<8x4xf32>
    tpu.vector_store %arg11[%c0_25, %c0_26], %34 {strides = array<i32>} : memref<8x4xf32, #tpu.memory_space<vmem>>, vector<8x4xf32>,
    return
  }
  func.func @transform_0(%arg0: i32) -> (i32, i32) {
    %c0_i32 = arith.constant 0 : i32
    %c0_i32_0 = arith.constant 0 : i32
    %c0_i32_1 = arith.constant 0 : i32
    return %c0_i32, %c0_i32_0 : i32, i32
  }
  func.func @transform_1(%arg0: i32) -> (i32, i32) {
    %c0_i32 = arith.constant 0 : i32
    %c0_i32_0 = arith.constant 0 : i32
    return %arg0, %c0_i32 : i32, i32
  }
  func.func @transform_2(%arg0: i32) -> (i32, i32) {
    %c0_i32 = arith.constant 0 : i32
    %c0_i32_0 = arith.constant 0 : i32
    %c0_i32_1 = arith.constant 0 : i32
    return %c0_i32, %c0_i32_0 : i32, i32
  }
  func.func @transform_3(%arg0: i32) -> (i32, i32) {
    %c0_i32 = arith.constant 0 : i32
    %c0_i32_0 = arith.constant 0 : i32
    %c0_i32_1 = arith.constant 0 : i32
    return %c0_i32, %c0_i32_0 : i32, i32
  }
  func.func @transform_4(%arg0: i32) -> (i32, i32) {
    %c0_i32 = arith.constant 0 : i32
    %c0_i32_0 = arith.constant 0 : i32
    %c0_i32_1 = arith.constant 0 : i32
    return %c0_i32, %c0_i32_0 : i32, i32
  }
  func.func @transform_5(%arg0: i32) -> (i32, i32) {
    %c0_i32 = arith.constant 0 : i32
    %c0_i32_0 = arith.constant 0 : i32
    %c0_i32_1 = arith.constant 0 : i32
    return %c0_i32, %c0_i32_0 : i32, i32
  }
  func.func @transform_6(%arg0: i32) -> (i32, i32) {
    %c0_i32 = arith.constant 0 : i32
    %c0_i32_0 = arith.constant 0 : i32
    %c0_i32_1 = arith.constant 0 : i32
    return %c0_i32, %c0_i32_0 : i32, i32
  }
  func.func @transform_7(%arg0: i32) -> (i32, i32) {
    %c0_i32 = arith.constant 0 : i32
    %c0_i32_0 = arith.constant 0 : i32
    %c0_i32_1 = arith.constant 0 : i32
    return %c0_i32, %c0_i32_0 : i32, i32
  }
  func.func @transform_8(%arg0: i32) -> (i32, i32) {
    %c0_i32 = arith.constant 0 : i32
    %c0_i32_0 = arith.constant 0 : i32
    %c0_i32_1 = arith.constant 0 : i32
    return %c0_i32, %c0_i32_0 : i32, i32
  }
  func.func @transform_9(%arg0: i32) -> (i32, i32) {
    %c0_i32 = arith.constant 0 : i32
    %c0_i32_0 = arith.constant 0 : i32
    %c0_i32_1 = arith.constant 0 : i32
    return %c0_i32, %c0_i32_0 : i32, i32
  }
  func.func @transform_10(%arg0: i32) -> (i32, i32) {
    %c0_i32 = arith.constant 0 : i32
    %c0_i32_0 = arith.constant 0 : i32
    return %arg0, %c0_i32 : i32, i32
  }
}

</mosaic_0001>

<bundles_post_ra>
// kernel: tpu_custom_call.1
= control target key start
LH: loop header
LB: loop body
LE: loop exit
PB: predicated region body
PF: predicated region fallthrough
CT: control target
= control target key end

     0   :  { %16 = vsyncpa [#allocation4], 0  ;;  %s1046_s0 = inlined_call_operand.<no memory space> [shape: f32[1,1], index: 0, kind: input, shape index: {}]   ;;  %s1047_s1 = inlined_call_operand.hbm [shape: bf16[8,16], index: 1, kind: input, shape index: {}]   ;;  %s1048_s2 = inlined_call_operand.hbm [shape: bf16[16,256], index: 2, kind: input, shape index: {}]   ;;  %s1049_s3 = inlined_call_operand.vmem [shape: f32[1,256], index: 3, kind: input, shape index: {}]   ;;  %s1050_s4 = inlined_call_operand.hbm [shape: bf16[256,128], index: 4, kind: input, shape index: {}]   ;;  %s1051_s5 = inlined_call_operand.vmem [shape: f32[1,128], index: 5, kind: input, shape index: {}]   ;;  %s1052_s6 = inlined_call_operand.hbm [shape: bf16[128,128], index: 6, kind: input, shape index: {}]   ;;  %s1053_s7 = inlined_call_operand.vmem [shape: f32[1,128], index: 7, kind: input, shape index: {}]   ;;  %s1054_s8 = inlined_call_operand.hbm [shape: bf16[128,128], index: 8, kind: input, shape index: {}]   ;;  %s1055_s9 = inlined_call_operand.vmem [shape: f32[1,128], index: 9, kind: input, shape index: {}]   ;;  %s1056_s10 = inlined_call_operand.vmem [shape: f32[8,4], index: 10, kind: output, shape index: {}]  }
   0x1   :  { %17 = vsyncpa [#allocation6], 0 }
   0x2   :  { %18 = vsyncpa [#allocation9], 0  ;;  %s874_s13 = smov [#allocation5]   ;;  %s758_s17 = scalar_lea.hbm %s1048_s2, 256 }
   0x3   :  { %s36_s14 = sshll.u32 %s874_s13, 4  ;;  %p759_p0 = scmp.ne.s32.totalorder %s1048_s2, %s758_s17  ;;  %s37_s14 = int_to_ptr.vmem [resolvable:$true] %s36_s14 }
   0x4   :  { %p762_p1 = scmp.lt.u32.totalorder %s758_s17, %s1048_s2 }
   0x6   :  { %p764_p2 = pnand %p762_p1, %p759_p0 }
   0x8   :  { %767 = shalt.err (!%p764_p2)
}
   0x9   :  { %s768_s22 = scalar_lea.vmem %s37_s14, 256  ;;  %p773_p4 = scmp.lt.s32.totalorder %s37_s14, %s37_s14 }
   0xa   :  { %p769_p3 = scmp.ne.s32.totalorder %s37_s14, %s768_s22  ;;  %p774_p5 = scmp.lt.s32.totalorder %s768_s22, %s768_s22 }
   0xc   :  { %p775_p6 = por %p774_p5, %p773_p4 }
   0xe   :  { %p776_p7 = pnand %p775_p6, %p769_p3 }
  0x10   :  { %779 = shalt.err (!%p776_p7)
}
  0x11   :  { %s875_s23 = smov 128   ;;  %s876_s24 = smov 8  }
  0x12   :  { %42 = dma.hbm_to_vmem [thread:$0]  %s1048_s2, 256, %s37_s14, [#allocation6], %s875_s23, %s875_s23, %s876_s24  }
  0x13   :  { %s877_s27 = smov [#allocation8]   ;;  %s878_s29 = smov [#allocation3]  }
  0x14   :  { %s64_s28 = sshll.u32 %s877_s27, 4  ;;  %s27_s30 = sshll.u32 %s878_s29, 4  ;;  %s65_s28 = int_to_ptr.vmem [resolvable:$true] %s64_s28  ;;  %s28_s30 = int_to_ptr.vmem [resolvable:$true] %s27_s30 }
  0x15   :  { %s780_s13 = scalar_lea.hbm %s1052_s6, 1024 }
  0x16   :  { %p781_p8 = scmp.ne.s32.totalorder %s1052_s6, %s780_s13  ;;  %p784_p9 = scmp.lt.u32.totalorder %s780_s13, %s1052_s6 }
  0x18   :  { %p786_p10 = pnand %p784_p9, %p781_p8 }
  0x1a   :  { %789 = shalt.err (!%p786_p10)
}
  0x1b   :  { %s790_s2 = scalar_lea.vmem %s65_s28, 1024  ;;  %p795_p12 = scmp.lt.s32.totalorder %s65_s28, %s65_s28 }
  0x1c   :  { %p791_p11 = scmp.ne.s32.totalorder %s65_s28, %s790_s2  ;;  %p796_p13 = scmp.lt.s32.totalorder %s790_s2, %s790_s2 }
  0x1e   :  { %p797_p0 = por %p796_p13, %p795_p12 }
  0x20   :  { %p798_p1 = pnand %p797_p0, %p791_p11 }
  0x22   :  { %801 = shalt.err (!%p798_p1)
}
  0x23   :  { %s879_s14 = smov 64   ;;  %s880_s19 = smov 4  }
  0x24   :  { %70 = dma.hbm_to_vmem [thread:$0]  %s1052_s6, 1024, %s65_s28, [#allocation9], %s879_s14, %s879_s14, %s880_s19  }
  0x25   :  { %s802_s24 = scalar_lea.hbm %s1047_s1, 64 }
  0x26   :  { %p803_p2 = scmp.ne.s32.totalorder %s1047_s1, %s802_s24  ;;  %p806_p3 = scmp.lt.u32.totalorder %s802_s24, %s1047_s1 }
  0x28   :  { %p808_p4 = pnand %p806_p3, %p803_p2 }
  0x2a   :  { %811 = shalt.err (!%p808_p4)
}
  0x2b   :  { %s812_s11 = scalar_lea.vmem %s28_s30, 64  ;;  %p817_p6 = scmp.lt.s32.totalorder %s28_s30, %s28_s30 }
  0x2c   :  { %p813_p5 = scmp.ne.s32.totalorder %s28_s30, %s812_s11  ;;  %p818_p7 = scmp.lt.s32.totalorder %s812_s11, %s812_s11 }
  0x2e   :  { %p819_p8 = por %p818_p7, %p817_p6 }
  0x30   :  { %p820_p9 = pnand %p819_p8, %p813_p5 }
  0x32   :  { %823 = shalt.err (!%p820_p9)
}
  0x33   :  { %30 = dma.hbm_to_vmem [thread:$0]  %s1047_s1, 64, %s28_s30, [#allocation4]  }
  0x34   :  { %s881_s12 = smov [#allocation7]   ;;  %s882_s15 = smov [#allocation10]  }
  0x35   :  { %s50_s13 = sshll.u32 %s881_s12, 4  ;;  %s78_s16 = sshll.u32 %s882_s15, 4  ;;  %s51_s13 = int_to_ptr.vmem [resolvable:$true] %s50_s13  ;;  %s79_s16 = int_to_ptr.vmem [resolvable:$true] %s78_s16 }
  0x36   :  { %s824_s2 = scalar_lea.hbm %s1050_s4, 2048 }
  0x37   :  { %p825_p10 = scmp.ne.s32.totalorder %s1050_s4, %s824_s2  ;;  %p828_p11 = scmp.lt.u32.totalorder %s824_s2, %s1050_s4 }
  0x39   :  { %p830_p12 = pnand %p828_p11, %p825_p10 }
  0x3b   :  { %833 = shalt.err (!%p830_p12)
}
  0x3c   :  { %s834_s1 = scalar_lea.vmem %s51_s13, 2048  ;;  %p839_p0 = scmp.lt.s32.totalorder %s51_s13, %s51_s13 }
  0x3d   :  { %p835_p13 = scmp.ne.s32.totalorder %s51_s13, %s834_s1  ;;  %p840_p1 = scmp.lt.s32.totalorder %s834_s1, %s834_s1 }
  0x3f   :  { %p841_p2 = por %p840_p1, %p839_p0 }
  0x41   :  { %p842_p3 = pnand %p841_p2, %p835_p13 }
  0x43   :  { %845 = shalt.err (!%p842_p3)
}
  0x44   :  { %56 = dma.hbm_to_vmem [thread:$0]  %s1050_s4, 2048, %s51_s13, [#allocation6], %s879_s14, %s879_s14, %s880_s19  }
  0x45   :  { %s846_s27 = scalar_lea.hbm %s1054_s8, 1024 }
  0x46   :  { %p847_p4 = scmp.ne.s32.totalorder %s1054_s8, %s846_s27  ;;  %p850_p5 = scmp.lt.u32.totalorder %s846_s27, %s1054_s8 }
  0x48   :  { %p852_p6 = pnand %p850_p5, %p847_p4 }
  0x4a   :  { %855 = shalt.err (!%p852_p6)
}
  0x4b   :  { %s856_s12 = scalar_lea.vmem %s79_s16, 1024  ;;  %p861_p8 = scmp.lt.s32.totalorder %s79_s16, %s79_s16 }
  0x4c   :  { %p857_p7 = scmp.ne.s32.totalorder %s79_s16, %s856_s12  ;;  %p862_p9 = scmp.lt.s32.totalorder %s856_s12, %s856_s12 }
  0x4e   :  { %p863_p10 = por %p862_p9, %p861_p8 }
  0x50   :  { %p864_p11 = pnand %p863_p10, %p857_p7 }
  0x52   :  { %867 = shalt.err (!%p864_p11)
}
  0x53   :  { %84 = dma.hbm_to_vmem [thread:$0]  %s1054_s8, 1024, %s79_s16, [#allocation9], %s879_s14, %s879_s14, %s880_s19  }
  0x54   :  { %868 = dma.done.wait [#allocation4], 64  }
  0x55   :  { %869 = vsyncadd [#allocation4], 4294967232 }
  0x56   :  { %870 = dma.done.wait [#allocation6], 2304  }
  0x57   :  { %871 = vsyncadd [#allocation6], 4294964992 }
  0x58   :  { %872 = dma.done.wait [#allocation9], 2048  }
  0x59   :  { %873 = vsyncadd [#allocation9], 4294965248  ;;  %v883_v0 = vmov 0   ;;  %v721_v1 = vld [vmem:[#allocation5 + $0x4] ss:$8 sps:$4 sm:$0xff]   ;;  %v724_v4 = vld [vmem:[#allocation7 + $0x40] sm:$0xff]   ;;  %v108_v27 = vlaneseq }
  0x5a   :  { %164 = vmatprep.mubr.bf16.mxu0 %v883_v0  ;;  %v723_v2 = vld [vmem:[#allocation5] ss:$8 sps:$4 sm:$0xff]   ;;  %v103_v3 = vld [vmem:[#allocation3] sm:$0xf]  ;;  %132 = vmatprep.subr.bf16.mxu0 %v721_v1  ;;  %vm128_vm0 = vcmask 130048   ;;  %v725_v5 = vld [vmem:[#allocation7] sm:$0xff]  }
  0x5b   :  { %133 = vmatpush1.bf16.msra.mxu0 %v723_v2  ;;  %629 = vmatprep.subr.bf16.mxu1 %v724_v4  ;;  %v726_v6 = vld [vmem:[#allocation7 + $0x48] sm:$0xff]   ;;  %v728_v8 = vld [vmem:[#allocation7 + $0x50] sm:$0xff]   ;;  %v730_v10 = vld [vmem:[#allocation7 + $0x58] sm:$0xff]   ;;  %v884_v21 = vmov 0.0   ;;  %v109_v28 = vshrl.u32 %v108_v27, 7  ;;  %vm885_vm1 = vmmov 0  }
  0x5c   :  { %630 = vmatpush3.bf16.msra.mxu1 %v725_v5  ;;  %v727_v7 = vld [vmem:[#allocation7 + $0x8] sm:$0xff]   ;;  %v729_v9 = vld [vmem:[#allocation7 + $0x10] sm:$0xff]   ;;  %v731_v11 = vld [vmem:[#allocation7 + $0x18] sm:$0xff]   ;;  %669 = vmatprep.subr.bf16.mxu0 %v884_v21  ;;  %vm582_vm2 = vcmask 31744  }
  0x5d   :  { %631 = vmatprep.subr.bf16.mxu1 %v726_v6  ;;  %v732_v12 = vld [vmem:[#allocation7 + $0x60] sm:$0xff]   ;;  %v734_v14 = vld [vmem:[#allocation7 + $0x68] sm:$0xff]   ;;  %v736_v16 = vld [vmem:[#allocation7 + $0x70] sm:$0xff]   ;;  %v110_v29 = vsub.s32 0, %v109_v28  ;;  %v114_v31 = vsub.s32 1, %v109_v28 }
  0x5e   :  { %593 = vmatmul.mubr.msk.bf16.vlgmr.msra.gmra.mrb[0].mxu0 %vm128_vm0, %v103_v3  ;;  %v733_v13 = vld [vmem:[#allocation7 + $0x20] sm:$0xff]   ;;  %v735_v15 = vld [vmem:[#allocation7 + $0x28] sm:$0xff]   ;;  %v737_v17 = vld [vmem:[#allocation7 + $0x30] sm:$0xff]  }
  0x5f   :  { %v738_v18 = vld [vmem:[#allocation7 + $0x78] sm:$0xff]   ;;  %v740_v20 = vld [vmem:[#allocation8] sm:$0xff]   ;;  %v741_v22 = vld [vmem:[#allocation8 + $0x8] sm:$0xff]   ;;  %685 = vmatprep.mubr.msk.bf16.mxu0 %vm885_vm1, %v884_v21 }
  0x60   :  { %632 = vmatpush3.bf16.msra.mxu1 %v727_v7  ;;  %v739_v19 = vld [vmem:[#allocation7 + $0x38] sm:$0xff]   ;;  %670 = vmatpush3.bf16.msra.mxu0 %v740_v20  ;;  %v742_v23 = vld [vmem:[#allocation8 + $0x10] sm:$0xff]   ;;  %v744_v25 = vld [vmem:[#allocation8 + $0x20] sm:$0xff]  }
  0x61   :  { %633 = vmatprep.subr.bf16.mxu1 %v728_v8  ;;  %671 = vmatprep.subr.bf16.mxu0 %v884_v21  ;;  %v743_v24 = vld [vmem:[#allocation8 + $0x18] sm:$0xff]   ;;  %v745_v26 = vld [vmem:[#allocation8 + $0x28] sm:$0xff]   ;;  %v746_v44 = vld [vmem:[#allocation8 + $0x30] sm:$0xff]  }
  0x62   :  { %v106_v30 = vld [vmem:[%s1049_s3] sm:$0x3]  ;;  %v747_v45 = vld [vmem:[#allocation8 + $0x38] sm:$0xff]   ;;  %v748_v46 = vld [vmem:[#allocation10] sm:$0xff]  }
  0x63   :  { %v111_v32 = vrot.slane %v106_v30, %v110_v29  ;;  %v115_v33 = vrot.slane %v106_v30, %v114_v31  ;;  %v749_v47 = vld [vmem:[#allocation10 + $0x8] sm:$0xff]   ;;  %v750_v48 = vld [vmem:[#allocation10 + $0x10] sm:$0xff]   ;;  %v751_v49 = vld [vmem:[#allocation10 + $0x18] sm:$0xff]  }
  0x64   :  { %634 = vmatpush3.bf16.msra.mxu1 %v729_v9  ;;  %672 = vmatpush3.bf16.msra.mxu0 %v741_v22  ;;  %v752_v50 = vld [vmem:[#allocation10 + $0x20] sm:$0xff]   ;;  %v753_v51 = vld [vmem:[#allocation10 + $0x28] sm:$0xff]   ;;  %v754_v61 = vld [vmem:[#allocation10 + $0x30] sm:$0xff]  }
  0x65   :  { %635 = vmatprep.subr.bf16.mxu1 %v730_v10  ;;  %673 = vmatprep.subr.bf16.mxu0 %v884_v21  ;;  %v594_v53 = vld [vmem:[%s1051_s5] ss:$0 sm:$0xff]  ;;  %v755_v62 = vld [vmem:[#allocation10 + $0x38] sm:$0xff]  }
  0x66   :  { %v611_v63 = vld [vmem:[%s1053_s7] ss:$0 sm:$0xff] }
  0x67   :  { %v620_v7 = vld [vmem:[%s1055_s9] ss:$0 sm:$0xff] }
  0x68   :  { %636 = vmatpush3.bf16.msra.mxu1 %v731_v11  ;;  %674 = vmatpush3.bf16.msra.mxu0 %v742_v23 }
  0x69   :  { %637 = vmatprep.subr.bf16.mxu1 %v732_v12  ;;  %675 = vmatprep.subr.bf16.mxu0 %v884_v21 }
  0x6c   :  { %638 = vmatpush3.bf16.msra.mxu1 %v733_v13  ;;  %676 = vmatpush3.bf16.msra.mxu0 %v743_v24  ;;  %v580_v13 = vstv %s1046_s0 }
  0x6d   :  { %639 = vmatprep.subr.bf16.mxu1 %v734_v14  ;;  %677 = vmatprep.subr.bf16.mxu0 %v884_v21 }
  0x70   :  { %640 = vmatpush3.bf16.msra.mxu1 %v735_v15  ;;  %678 = vmatpush3.bf16.msra.mxu0 %v744_v25 }
  0x71   :  { %641 = vmatprep.subr.bf16.mxu1 %v736_v16  ;;  %679 = vmatprep.subr.bf16.mxu0 %v884_v21 }
  0x74   :  { %642 = vmatpush3.bf16.msra.mxu1 %v737_v17  ;;  %680 = vmatpush3.bf16.msra.mxu0 %v745_v26 }
  0x75   :  { %643 = vmatprep.subr.bf16.mxu1 %v738_v18  ;;  %681 = vmatprep.subr.bf16.mxu0 %v884_v21 }
  0x78   :  { %644 = vmatpush3.bf16.msra.mxu1 %v739_v19  ;;  %682 = vmatpush3.bf16.msra.mxu0 %v746_v44 }
  0x79   :  { %689 = vmatprep.subr.bf16.mxu1 %v884_v21  ;;  %683 = vmatprep.subr.bf16.mxu0 %v884_v21 }
  0x7c   :  { %684 = vmatpush3.bf16.msra.mxu0 %v747_v45 }
 0x131   :  { %v166_v34 = vpop.f32.mrb[0].mxu0 }
 0x132   :  { %v167_v35 = vadd.f32 %v166_v34, %v111_v32  ;;  %v168_v36 = vpop.f32.mrb[1].mxu0 }
 0x133   :  { %v169_v37 = vadd.f32 %v168_v36, %v115_v33  ;;  %v170_v38 = vpop.f32.mrb[2].mxu0 }
 0x134   :  { %v173_v39 = vmax.f32 %v167_v35, 0.0  ;;  %v171_v40 = vpop.f32.mrb[3].mxu0 }
 0x135   :  { %v174_v41 = vmax.f32 %v169_v37, 0.0 }
 0x136   :  { %v175_v43 = vpack.c.bf16 %v173_v39, %v173_v39 }
 0x137   :  { %v176_v42 = vpack.c.bf16 %v174_v41, %v174_v41 }
 0x139   :  { %344 = vmatprep.mubr.bf16.mxu1 %v176_v42 }
 0x13a   :  { %345 = vmatmul.mubr.bf16.vlgmr.msra.gmra.mrb[0].mxu1 %v175_v43 }
 0x13b   :  { %705 = vmatprep.mubr.msk.bf16.mxu1 %vm885_vm1, %v884_v21  ;;  %690 = vmatpush3.bf16.msra.mxu1 %v748_v46 }
 0x13c   :  { %691 = vmatprep.subr.bf16.mxu1 %v884_v21 }
 0x13f   :  { %692 = vmatpush3.bf16.msra.mxu1 %v749_v47 }
 0x140   :  { %693 = vmatprep.subr.bf16.mxu1 %v884_v21 }
 0x143   :  { %694 = vmatpush3.bf16.msra.mxu1 %v750_v48 }
 0x144   :  { %695 = vmatprep.subr.bf16.mxu1 %v884_v21 }
 0x147   :  { %696 = vmatpush3.bf16.msra.mxu1 %v751_v49 }
 0x148   :  { %697 = vmatprep.subr.bf16.mxu1 %v884_v21 }
 0x14b   :  { %698 = vmatpush3.bf16.msra.mxu1 %v752_v50 }
 0x14c   :  { %699 = vmatprep.subr.bf16.mxu1 %v884_v21 }
 0x14f   :  { %700 = vmatpush3.bf16.msra.mxu1 %v753_v51 }
 0x150   :  { %701 = vmatprep.subr.bf16.mxu1 %v884_v21 }
 0x153   :  { %702 = vmatpush3.bf16.msra.mxu1 %v754_v61 }
 0x154   :  { %703 = vmatprep.subr.bf16.mxu1 %v884_v21 }
 0x157   :  { %704 = vmatpush3.bf16.msra.mxu1 %v755_v62 }
 0x20d   :  { %v645_v52 = vpop.f32.mrb[0].mxu1 }
 0x20e   :  { %v646_v54 = vpop.f32.mrb[1].mxu1 }
 0x20f   :  { %v647_v55 = vadd.f32 %v646_v54, %v645_v52  ;;  %v648_v56 = vpop.f32.mrb[2].mxu1 }
 0x210   :  { %v649_v57 = vpop.f32.mrb[3].mxu1 }
 0x211   :  { %v347_v58 = vadd.f32 %v647_v55, %v594_v53 }
 0x213   :  { %v352_v59 = vmax.f32 %v347_v58, 0.0 }
 0x215   :  { %v353_v60 = vpack.c.bf16 %v352_v59, %v352_v59 }
 0x217   :  { %686 = vmatmul.mubr.bf16.vlgmr.msra.gmra.mrb[4].mxu0 %v353_v60 }
 0x2ea   :  { %v459_v0 = vpop.f32.mrb[4].mxu0 }
 0x2eb   :  { %v460_v1 = vadd.f32 %v611_v63, %v459_v0  ;;  %v687_v2 = vpop.f32.mrb[5].mxu0 }
 0x2ec   :  { %v462_v3 = vpop.f32.mrb[6].mxu0 }
 0x2ed   :  { %v465_v4 = vmax.f32 %v460_v1, 0.0  ;;  %v688_v5 = vpop.f32.mrb[7].mxu0 }
 0x2ef   :  { %v466_v6 = vpack.c.bf16 %v465_v4, %v465_v4 }
 0x2f1   :  { %706 = vmatmul.mubr.bf16.vlgmr.msra.gmra.mrb[4].mxu1 %v466_v6 }
 0x3c4   :  { %v572_v8 = vpop.f32.mrb[4].mxu1 }
 0x3c5   :  { %v573_v9 = vadd.f32 %v620_v7, %v572_v8  ;;  %v707_v10 = vpop.f32.mrb[5].mxu1 }
 0x3c6   :  { %v575_v11 = vpop.f32.mrb[6].mxu1 }
 0x3c7   :  { %756 = vtanh.f32 %v573_v9  ;;  %v708_v12 = vpop.f32.mrb[7].mxu1 }
 0x3d1   :  { %v757_v14 = vpop.eup %756 }
 0x3d2   :  { %v581_v15 = vmul.f32 %v757_v14, %v580_v13 }
 0x3d4   :  { %583 = vst.msk [vmem:[%s1056_s10] sm:$0xff] %vm582_vm2, %v581_v15 }
 0x3d5   :  { %588 = vsyncpa [#allocation4], 1 }
 0x3d6   :  { %589 = vsyncpa [#allocation6], 1 }
 0x3d7   :  { %590 = vsyncpa [#allocation9], 1 }

// kernel: tpu_custom_call.1
= control target key start
LH: loop header
LB: loop body
LE: loop exit
PB: predicated region body
PF: predicated region fallthrough
CT: control target
= control target key end

     0   :  { %16 = vsyncpa [#allocation4], 0  ;;  %s1046_s0 = inlined_call_operand.<no memory space> [shape: f32[1,1], index: 0, kind: input, shape index: {}]   ;;  %s1047_s1 = inlined_call_operand.hbm [shape: bf16[8,16], index: 1, kind: input, shape index: {}]   ;;  %s1048_s2 = inlined_call_operand.hbm [shape: bf16[16,256], index: 2, kind: input, shape index: {}]   ;;  %s1049_s3 = inlined_call_operand.vmem [shape: f32[1,256], index: 3, kind: input, shape index: {}]   ;;  %s1050_s4 = inlined_call_operand.hbm [shape: bf16[256,128], index: 4, kind: input, shape index: {}]   ;;  %s1051_s5 = inlined_call_operand.vmem [shape: f32[1,128], index: 5, kind: input, shape index: {}]   ;;  %s1052_s6 = inlined_call_operand.hbm [shape: bf16[128,128], index: 6, kind: input, shape index: {}]   ;;  %s1053_s7 = inlined_call_operand.vmem [shape: f32[1,128], index: 7, kind: input, shape index: {}]   ;;  %s1054_s8 = inlined_call_operand.hbm [shape: bf16[128,128], index: 8, kind: input, shape index: {}]   ;;  %s1055_s9 = inlined_call_operand.vmem [shape: f32[1,128], index: 9, kind: input, shape index: {}]   ;;  %s1056_s10 = inlined_call_operand.vmem [shape: f32[8,4], index: 10, kind: output, shape index: {}]  }
   0x1   :  { %17 = vsyncpa [#allocation6], 0 }
   0x2   :  { %18 = vsyncpa [#allocation9], 0  ;;  %s874_s13 = smov [#allocation5]   ;;  %s758_s17 = scalar_lea.hbm %s1048_s2, 256 }
   0x3   :  { %s36_s14 = sshll.u32 %s874_s13, 4  ;;  %p759_p0 = scmp.ne.s32.totalorder %s1048_s2, %s758_s17  ;;  %s37_s14 = int_to_ptr.vmem [resolvable:$true] %s36_s14 }
   0x4   :  { %p762_p1 = scmp.lt.u32.totalorder %s758_s17, %s1048_s2 }
   0x6   :  { %p764_p2 = pnand %p762_p1, %p759_p0 }
   0x8   :  { %767 = shalt.err (!%p764_p2)
}
   0x9   :  { %s768_s22 = scalar_lea.vmem %s37_s14, 256  ;;  %p773_p4 = scmp.lt.s32.totalorder %s37_s14, %s37_s14 }
   0xa   :  { %p769_p3 = scmp.ne.s32.totalorder %s37_s14, %s768_s22  ;;  %p774_p5 = scmp.lt.s32.totalorder %s768_s22, %s768_s22 }
   0xc   :  { %p775_p6 = por %p774_p5, %p773_p4 }
   0xe   :  { %p776_p7 = pnand %p775_p6, %p769_p3 }
  0x10   :  { %779 = shalt.err (!%p776_p7)
}
  0x11   :  { %s875_s23 = smov 128   ;;  %s876_s24 = smov 8  }
  0x12   :  { %42 = dma.hbm_to_vmem [thread:$0]  %s1048_s2, 256, %s37_s14, [#allocation6], %s875_s23, %s875_s23, %s876_s24  }
  0x13   :  { %s877_s27 = smov [#allocation8]   ;;  %s878_s29 = smov [#allocation3]  }
  0x14   :  { %s64_s28 = sshll.u32 %s877_s27, 4  ;;  %s27_s30 = sshll.u32 %s878_s29, 4  ;;  %s65_s28 = int_to_ptr.vmem [resolvable:$true] %s64_s28  ;;  %s28_s30 = int_to_ptr.vmem [resolvable:$true] %s27_s30 }
  0x15   :  { %s780_s13 = scalar_lea.hbm %s1052_s6, 1024 }
  0x16   :  { %p781_p8 = scmp.ne.s32.totalorder %s1052_s6, %s780_s13  ;;  %p784_p9 = scmp.lt.u32.totalorder %s780_s13, %s1052_s6 }
  0x18   :  { %p786_p10 = pnand %p784_p9, %p781_p8 }
  0x1a   :  { %789 = shalt.err (!%p786_p10)
}
  0x1b   :  { %s790_s2 = scalar_lea.vmem %s65_s28, 1024  ;;  %p795_p12 = scmp.lt.s32.totalorder %s65_s28, %s65_s28 }
  0x1c   :  { %p791_p11 = scmp.ne.s32.totalorder %s65_s28, %s790_s2  ;;  %p796_p13 = scmp.lt.s32.totalorder %s790_s2, %s790_s2 }
  0x1e   :  { %p797_p0 = por %p796_p13, %p795_p12 }
  0x20   :  { %p798_p1 = pnand %p797_p0, %p791_p11 }
  0x22   :  { %801 = shalt.err (!%p798_p1)
}
  0x23   :  { %s879_s14 = smov 64   ;;  %s880_s19 = smov 4  }
  0x24   :  { %70 = dma.hbm_to_vmem [thread:$0]  %s1052_s6, 1024, %s65_s28, [#allocation9], %s879_s14, %s879_s14, %s880_s19  }
  0x25   :  { %s802_s24 = scalar_lea.hbm %s1047_s1, 64 }
  0x26   :  { %p803_p2 = scmp.ne.s32.totalorder %s1047_s1, %s802_s24  ;;  %p806_p3 = scmp.lt.u32.totalorder %s802_s24, %s1047_s1 }
  0x28   :  { %p808_p4 = pnand %p806_p3, %p803_p2 }
  0x2a   :  { %811 = shalt.err (!%p808_p4)
}
  0x2b   :  { %s812_s11 = scalar_lea.vmem %s28_s30, 64  ;;  %p817_p6 = scmp.lt.s32.totalorder %s28_s30, %s28_s30 }
  0x2c   :  { %p813_p5 = scmp.ne.s32.totalorder %s28_s30, %s812_s11  ;;  %p818_p7 = scmp.lt.s32.totalorder %s812_s11, %s812_s11 }
  0x2e   :  { %p819_p8 = por %p818_p7, %p817_p6 }
  0x30   :  { %p820_p9 = pnand %p819_p8, %p813_p5 }
  0x32   :  { %823 = shalt.err (!%p820_p9)
}
  0x33   :  { %30 = dma.hbm_to_vmem [thread:$0]  %s1047_s1, 64, %s28_s30, [#allocation4]  }
  0x34   :  { %s881_s12 = smov [#allocation7]   ;;  %s882_s15 = smov [#allocation10]  }
  0x35   :  { %s50_s13 = sshll.u32 %s881_s12, 4  ;;  %s78_s16 = sshll.u32 %s882_s15, 4  ;;  %s51_s13 = int_to_ptr.vmem [resolvable:$true] %s50_s13  ;;  %s79_s16 = int_to_ptr.vmem [resolvable:$true] %s78_s16 }
  0x36   :  { %s824_s2 = scalar_lea.hbm %s1050_s4, 2048 }
  0x37   :  { %p825_p10 = scmp.ne.s32.totalorder %s1050_s4, %s824_s2  ;;  %p828_p11 = scmp.lt.u32.totalorder %s824_s2, %s1050_s4 }
  0x39   :  { %p830_p12 = pnand %p828_p11, %p825_p10 }
  0x3b   :  { %833 = shalt.err (!%p830_p12)
}
  0x3c   :  { %s834_s1 = scalar_lea.vmem %s51_s13, 2048  ;;  %p839_p0 = scmp.lt.s32.totalorder %s51_s13, %s51_s13 }
  0x3d   :  { %p835_p13 = scmp.ne.s32.totalorder %s51_s13, %s834_s1  ;;  %p840_p1 = scmp.lt.s32.totalorder %s834_s1, %s834_s1 }
  0x3f   :  { %p841_p2 = por %p840_p1, %p839_p0 }
  0x41   :  { %p842_p3 = pnand %p841_p2, %p835_p13 }
  0x43   :  { %845 = shalt.err (!%p842_p3)
}
  0x44   :  { %56 = dma.hbm_to_vmem [thread:$0]  %s1050_s4, 2048, %s51_s13, [#allocation6], %s879_s14, %s879_s14, %s880_s19  }
  0x45   :  { %s846_s27 = scalar_lea.hbm %s1054_s8, 1024 }
  0x46   :  { %p847_p4 = scmp.ne.s32.totalorder %s1054_s8, %s846_s27  ;;  %p850_p5 = scmp.lt.u32.totalorder %s846_s27, %s1054_s8 }
  0x48   :  { %p852_p6 = pnand %p850_p5, %p847_p4 }
  0x4a   :  { %855 = shalt.err (!%p852_p6)
}
  0x4b   :  { %s856_s12 = scalar_lea.vmem %s79_s16, 1024  ;;  %p861_p8 = scmp.lt.s32.totalorder %s79_s16, %s79_s16 }
  0x4c   :  { %p857_p7 = scmp.ne.s32.totalorder %s79_s16, %s856_s12  ;;  %p862_p9 = scmp.lt.s32.totalorder %s856_s12, %s856_s12 }
  0x4e   :  { %p863_p10 = por %p862_p9, %p861_p8 }
  0x50   :  { %p864_p11 = pnand %p863_p10, %p857_p7 }
  0x52   :  { %867 = shalt.err (!%p864_p11)
}
  0x53   :  { %84 = dma.hbm_to_vmem [thread:$0]  %s1054_s8, 1024, %s79_s16, [#allocation9], %s879_s14, %s879_s14, %s880_s19  }
  0x54   :  { %868 = dma.done.wait [#allocation4], 64  }
  0x55   :  { %869 = vsyncadd [#allocation4], 4294967232 }
  0x56   :  { %870 = dma.done.wait [#allocation6], 2304  }
  0x57   :  { %871 = vsyncadd [#allocation6], 4294964992 }
  0x58   :  { %872 = dma.done.wait [#allocation9], 2048  }
  0x59   :  { %873 = vsyncadd [#allocation9], 4294965248  ;;  %v883_v0 = vmov 0   ;;  %v721_v1 = vld [vmem:[#allocation5 + $0x4] ss:$8 sps:$4 sm:$0xff]   ;;  %v724_v4 = vld [vmem:[#allocation7 + $0x40] sm:$0xff]   ;;  %v108_v27 = vlaneseq }
  0x5a   :  { %164 = vmatprep.mubr.bf16.mxu0 %v883_v0  ;;  %v723_v2 = vld [vmem:[#allocation5] ss:$8 sps:$4 sm:$0xff]   ;;  %v103_v3 = vld [vmem:[#allocation3] sm:$0xf]  ;;  %132 = vmatprep.subr.bf16.mxu0 %v721_v1  ;;  %vm128_vm0 = vcmask 130048   ;;  %v725_v5 = vld [vmem:[#allocation7] sm:$0xff]  }
  0x5b   :  { %133 = vmatpush1.bf16.msra.mxu0 %v723_v2  ;;  %629 = vmatprep.subr.bf16.mxu1 %v724_v4  ;;  %v726_v6 = vld [vmem:[#allocation7 + $0x48] sm:$0xff]   ;;  %v728_v8 = vld [vmem:[#allocation7 + $0x50] sm:$0xff]   ;;  %v730_v10 = vld [vmem:[#allocation7 + $0x58] sm:$0xff]   ;;  %v884_v21 = vmov 0.0   ;;  %v109_v28 = vshrl.u32 %v108_v27, 7  ;;  %vm885_vm1 = vmmov 0  }
  0x5c   :  { %630 = vmatpush3.bf16.msra.mxu1 %v725_v5  ;;  %v727_v7 = vld [vmem:[#allocation7 + $0x8] sm:$0xff]   ;;  %v729_v9 = vld [vmem:[#allocation7 + $0x10] sm:$0xff]   ;;  %v731_v11 = vld [vmem:[#allocation7 + $0x18] sm:$0xff]   ;;  %669 = vmatprep.subr.bf16.mxu0 %v884_v21  ;;  %vm582_vm2 = vcmask 31744  }
  0x5d   :  { %631 = vmatprep.subr.bf16.mxu1 %v726_v6  ;;  %v732_v12 = vld [vmem:[#allocation7 + $0x60] sm:$0xff]   ;;  %v734_v14 = vld [vmem:[#allocation7 + $0x68] sm:$0xff]   ;;  %v736_v16 = vld [vmem:[#allocation7 + $0x70] sm:$0xff]   ;;  %v110_v29 = vsub.s32 0, %v109_v28  ;;  %v114_v31 = vsub.s32 1, %v109_v28 }
  0x5e   :  { %593 = vmatmul.mubr.msk.bf16.vlgmr.msra.gmra.mrb[0].mxu0 %vm128_vm0, %v103_v3  ;;  %v733_v13 = vld [vmem:[#allocation7 + $0x20] sm:$0xff]   ;;  %v735_v15 = vld [vmem:[#allocation7 + $0x28] sm:$0xff]   ;;  %v737_v17 = vld [vmem:[#allocation7 + $0x30] sm:$0xff]  }
  0x5f   :  { %v738_v18 = vld [vmem:[#allocation7 + $0x78] sm:$0xff]   ;;  %v740_v20 = vld [vmem:[#allocation8] sm:$0xff]   ;;  %v741_v22 = vld [vmem:[#allocation8 + $0x8] sm:$0xff]   ;;  %685 = vmatprep.mubr.msk.bf16.mxu0 %vm885_vm1, %v884_v21 }
  0x60   :  { %632 = vmatpush3.bf16.msra.mxu1 %v727_v7  ;;  %v739_v19 = vld [vmem:[#allocation7 + $0x38] sm:$0xff]   ;;  %670 = vmatpush3.bf16.msra.mxu0 %v740_v20  ;;  %v742_v23 = vld [vmem:[#allocation8 + $0x10] sm:$0xff]   ;;  %v744_v25 = vld [vmem:[#allocation8 + $0x20] sm:$0xff]  }
  0x61   :  { %633 = vmatprep.subr.bf16.mxu1 %v728_v8  ;;  %671 = vmatprep.subr.bf16.mxu0 %v884_v21  ;;  %v743_v24 = vld [vmem:[#allocation8 + $0x18] sm:$0xff]   ;;  %v745_v26 = vld [vmem:[#allocation8 + $0x28] sm:$0xff]   ;;  %v746_v44 = vld [vmem:[#allocation8 + $0x30] sm:$0xff]  }
  0x62   :  { %v106_v30 = vld [vmem:[%s1049_s3] sm:$0x3]  ;;  %v747_v45 = vld [vmem:[#allocation8 + $0x38] sm:$0xff]   ;;  %v748_v46 = vld [vmem:[#allocation10] sm:$0xff]  }
  0x63   :  { %v111_v32 = vrot.slane %v106_v30, %v110_v29  ;;  %v115_v33 = vrot.slane %v106_v30, %v114_v31  ;;  %v749_v47 = vld [vmem:[#allocation10 + $0x8] sm:$0xff]   ;;  %v750_v48 = vld [vmem:[#allocation10 + $0x10] sm:$0xff]   ;;  %v751_v49 = vld [vmem:[#allocation10 + $0x18] sm:$0xff]  }
  0x64   :  { %634 = vmatpush3.bf16.msra.mxu1 %v729_v9  ;;  %672 = vmatpush3.bf16.msra.mxu0 %v741_v22  ;;  %v752_v50 = vld [vmem:[#allocation10 + $0x20] sm:$0xff]   ;;  %v753_v51 = vld [vmem:[#allocation10 + $0x28] sm:$0xff]   ;;  %v754_v61 = vld [vmem:[#allocation10 + $0x30] sm:$0xff]  }
  0x65   :  { %635 = vmatprep.subr.bf16.mxu1 %v730_v10  ;;  %673 = vmatprep.subr.bf16.mxu0 %v884_v21  ;;  %v594_v53 = vld [vmem:[%s1051_s5] ss:$0 sm:$0xff]  ;;  %v755_v62 = vld [vmem:[#allocation10 + $0x38] sm:$0xff]  }
  0x66   :  { %v611_v63 = vld [vmem:[%s1053_s7] ss:$0 sm:$0xff] }
  0x67   :  { %v620_v7 = vld [vmem:[%s1055_s9] ss:$0 sm:$0xff] }
  0x68   :  { %636 = vmatpush3.bf16.msra.mxu1 %v731_v11  ;;  %674 = vmatpush3.bf16.msra.mxu0 %v742_v23 }
  0x69   :  { %637 = vmatprep.subr.bf16.mxu1 %v732_v12  ;;  %675 = vmatprep.subr.bf16.mxu0 %v884_v21 }
  0x6c   :  { %638 = vmatpush3.bf16.msra.mxu1 %v733_v13  ;;  %676 = vmatpush3.bf16.msra.mxu0 %v743_v24  ;;  %v580_v13 = vstv %s1046_s0 }
  0x6d   :  { %639 = vmatprep.subr.bf16.mxu1 %v734_v14  ;;  %677 = vmatprep.subr.bf16.mxu0 %v884_v21 }
  0x70   :  { %640 = vmatpush3.bf16.msra.mxu1 %v735_v15  ;;  %678 = vmatpush3.bf16.msra.mxu0 %v744_v25 }
  0x71   :  { %641 = vmatprep.subr.bf16.mxu1 %v736_v16  ;;  %679 = vmatprep.subr.bf16.mxu0 %v884_v21 }
  0x74   :  { %642 = vmatpush3.bf16.msra.mxu1 %v737_v17  ;;  %680 = vmatpush3.bf16.msra.mxu0 %v745_v26 }
  0x75   :  { %643 = vmatprep.subr.bf16.mxu1 %v738_v18  ;;  %681 = vmatprep.subr.bf16.mxu0 %v884_v21 }
  0x78   :  { %644 = vmatpush3.bf16.msra.mxu1 %v739_v19  ;;  %682 = vmatpush3.bf16.msra.mxu0 %v746_v44 }
  0x79   :  { %689 = vmatprep.subr.bf16.mxu1 %v884_v21  ;;  %683 = vmatprep.subr.bf16.mxu0 %v884_v21 }
  0x7c   :  { %684 = vmatpush3.bf16.msra.mxu0 %v747_v45 }
 0x131   :  { %v166_v34 = vpop.f32.mrb[0].mxu0 }
 0x132   :  { %v167_v35 = vadd.f32 %v166_v34, %v111_v32  ;;  %v168_v36 = vpop.f32.mrb[1].mxu0 }
 0x133   :  { %v169_v37 = vadd.f32 %v168_v36, %v115_v33  ;;  %v170_v38 = vpop.f32.mrb[2].mxu0 }
 0x134   :  { %v173_v39 = vmax.f32 %v167_v35, 0.0  ;;  %v171_v40 = vpop.f32.mrb[3].mxu0 }
 0x135   :  { %v174_v41 = vmax.f32 %v169_v37, 0.0 }
 0x136   :  { %v175_v43 = vpack.c.bf16 %v173_v39, %v173_v39 }
 0x137   :  { %v176_v42 = vpack.c.bf16 %v174_v41, %v174_v41 }
 0x139   :  { %344 = vmatprep.mubr.bf16.mxu1 %v176_v42 }
 0x13a   :  { %345 = vmatmul.mubr.bf16.vlgmr.msra.gmra.mrb[0].mxu1 %v175_v43 }
 0x13b   :  { %705 = vmatprep.mubr.msk.bf16.mxu1 %vm885_vm1, %v884_v21  ;;  %690 = vmatpush3.bf16.msra.mxu1 %v748_v46 }
 0x13c   :  { %691 = vmatprep.subr.bf16.mxu1 %v884_v21 }
 0x13f   :  { %692 = vmatpush3.bf16.msra.mxu1 %v749_v47 }
 0x140   :  { %693 = vmatprep.subr.bf16.mxu1 %v884_v21 }
 0x143   :  { %694 = vmatpush3.bf16.msra.mxu1 %v750_v48 }
 0x144   :  { %695 = vmatprep.subr.bf16.mxu1 %v884_v21 }
 0x147   :  { %696 = vmatpush3.bf16.msra.mxu1 %v751_v49 }
 0x148   :  { %697 = vmatprep.subr.bf16.mxu1 %v884_v21 }
 0x14b   :  { %698 = vmatpush3.bf16.msra.mxu1 %v752_v50 }
 0x14c   :  { %699 = vmatprep.subr.bf16.mxu1 %v884_v21 }
 0x14f   :  { %700 = vmatpush3.bf16.msra.mxu1 %v753_v51 }
 0x150   :  { %701 = vmatprep.subr.bf16.mxu1 %v884_v21 }
 0x153   :  { %702 = vmatpush3.bf16.msra.mxu1 %v754_v61 }
 0x154   :  { %703 = vmatprep.subr.bf16.mxu1 %v884_v21 }
 0x157   :  { %704 = vmatpush3.bf16.msra.mxu1 %v755_v62 }
 0x20d   :  { %v645_v52 = vpop.f32.mrb[0].mxu1 }
 0x20e   :  { %v646_v54 = vpop.f32.mrb[1].mxu1 }
 0x20f   :  { %v647_v55 = vadd.f32 %v646_v54, %v645_v52  ;;  %v648_v56 = vpop.f32.mrb[2].mxu1 }
 0x210   :  { %v649_v57 = vpop.f32.mrb[3].mxu1 }
 0x211   :  { %v347_v58 = vadd.f32 %v647_v55, %v594_v53 }
 0x213   :  { %v352_v59 = vmax.f32 %v347_v58, 0.0 }
 0x215   :  { %v353_v60 = vpack.c.bf16 %v352_v59, %v352_v59 }
 0x217   :  { %686 = vmatmul.mubr.bf16.vlgmr.msra.gmra.mrb[4].mxu0 %v353_v60 }
 0x2ea   :  { %v459_v0 = vpop.f32.mrb[4].mxu0 }
 0x2eb   :  { %v460_v1 = vadd.f32 %v611_v63, %v459_v0  ;;  %v687_v2 = vpop.f32.mrb[5].mxu0 }
 0x2ec   :  { %v462_v3 = vpop.f32.mrb[6].mxu0 }
 0x2ed   :  { %v465_v4 = vmax.f32 %v460_v1, 0.0  ;;  %v688_v5 = vpop.f32.mrb[7].mxu0 }
 0x2ef   :  { %v466_v6 = vpack.c.bf16 %v465_v4, %v465_v4 }
 0x2f1   :  { %706 = vmatmul.mubr.bf16.vlgmr.msra.gmra.mrb[4].mxu1 %v466_v6 }
 0x3c4   :  { %v572_v8 = vpop.f32.mrb[4].mxu1 }
 0x3c5   :  { %v573_v9 = vadd.f32 %v620_v7, %v572_v8  ;;  %v707_v10 = vpop.f32.mrb[5].mxu1 }
 0x3c6   :  { %v575_v11 = vpop.f32.mrb[6].mxu1 }
 0x3c7   :  { %756 = vtanh.f32 %v573_v9  ;;  %v708_v12 = vpop.f32.mrb[7].mxu1 }
 0x3d1   :  { %v757_v14 = vpop.eup %756 }
 0x3d2   :  { %v581_v15 = vmul.f32 %v757_v14, %v580_v13 }
 0x3d4   :  { %583 = vst.msk [vmem:[%s1056_s10] sm:$0xff] %vm582_vm2, %v581_v15 }
 0x3d5   :  { %588 = vsyncpa [#allocation4], 1 }
 0x3d6   :  { %589 = vsyncpa [#allocation6], 1 }
 0x3d7   :  { %590 = vsyncpa [#allocation9], 1 }

</bundles_post_ra>
